<compile_context>
chip_gen: v7x
topology: tpu7x:2x2x1
jax: 0.10.0
libtpu: 0.0.40
codegen_flags: <defaults>
</compile_context>

<pallas_src>
import functools

import jax
import jax.numpy as jnp
from jax.experimental import pallas as pl
from jax.experimental.pallas import tpu as pltpu


def _round_up(x: int, m: int) -> int:
    return (x + m - 1) // m * m


def _actor_kernel(state_ref, emb_ref,
                  w1_ref, b1_ref,
                  w2_ref, b2_ref,
                  w3_ref, b3_ref,
                  wo_ref, bo_ref,
                  out_ref):
    """Fused 4-layer MLP for one batch tile.

    state_ref: (TB, 1) f32        emb_ref: (TB, E) f32
    w1_ref:    (1+E, H) f32       b{1,2,3}_ref: (1, H) f32
    w{2,3}_ref:(H, H) bf16        wo_ref: (1, H) f32      bo_ref: (1, 1) f32
    out_ref:   (TB, 1) f32
    """
    state = state_ref[...]                       # (TB, 1)
    emb = emb_ref[...]                           # (TB, E)
    w1 = w1_ref[...]                             # (1+E, H)

    # --- fc1 on the VPU: K = 1 + E (= 4) is far too small for the MXU. ------
    h = b1_ref[...] + state * w1[0:1, :]         # (TB,1) * (1,H) broadcast
    for j in range(emb.shape[1]):                # E is tiny & static -> unrolled
        h = h + emb[:, j:j + 1] * w1[j + 1:j + 2, :]
    h = jnp.maximum(h, 0.0)                      # ReLU (f32)

    # --- fc2 / fc3 on the MXU: bf16 inputs, f32 accumulate, f32 epilogue. ---
    h = jnp.dot(h.astype(jnp.bfloat16), w2_ref[...],
                preferred_element_type=jnp.float32)
    h = jnp.maximum(h + b2_ref[...], 0.0)

    h = jnp.dot(h.astype(jnp.bfloat16), w3_ref[...],
                preferred_element_type=jnp.float32)
    h = jnp.maximum(h + b3_ref[...], 0.0)

    # --- fc_out (H -> 1) as a lane reduction instead of a 1-wide matmul. ----
    y = jnp.sum(h * wo_ref[...], axis=-1, keepdims=True) + bo_ref[...]
    out_ref[...] = y.astype(out_ref.dtype)       # (TB, 1)


@functools.partial(jax.jit, static_argnames=("block_b",))
def actor_forward(state, env_emb, params, *, block_b: int = 512):
    """JAX wrapper mirroring Actor.forward(state, env_emb) -> (B, 1)."""
    w1, b1, w2, b2, w3, b3, wo, bo = params
    batch = state.shape[0]
    embed_dim = env_emb.shape[-1]
    input_dim = w1.shape[0]
    hidden = w1.shape[1]

    # bf16 weights for the MXU layers (halves weight DMA / VMEM bytes).
    w2_bf = w2.astype(jnp.bfloat16)
    w3_bf = w3.astype(jnp.bfloat16)
    wo_row = wo.reshape(1, hidden)               # (H,1) -> (1,H) for lane-reduce
    bo_s = bo.reshape(1, 1)

    # Batch tile: multiple of 8 sublanes; default 512 rows (multiple of 128 for
    # v5e's 4x128 MXU and of 256 for v6e/v7x) and far below v7x's 32 MiB scoped
    # VMEM budget.
    tb = min(block_b, _round_up(batch, 8))
    padded = _round_up(batch, tb)
    if padded != batch:
        pad = padded - batch
        state = jnp.pad(state, ((0, pad), (0, 0)))
        env_emb = jnp.pad(env_emb, ((0, pad), (0, 0)))

    grid = (padded // tb,)

    def act_spec(feat):
        return pl.BlockSpec((tb, feat), lambda i: (i, 0))

    def const_spec(shape):
        # Constant block index -> the array is DMA'd into VMEM exactly once and
        # stays resident across all batch tiles.
        return pl.BlockSpec(shape, lambda i: (0, 0))

    flops = 2 * padded * (input_dim * hidden + 2 * hidden * hidden + hidden)
    bytes_accessed = (
        state.size * 4 + env_emb.size * 4 + padded * 4          # activations
        + w1.size * 4 + w2_bf.size * 2 + w3_bf.size * 2         # weights
        + (b1.size + b2.size + b3.size + wo.size + bo.size) * 4)  # biases

    out = pl.pallas_call(
        _actor_kernel,
        out_shape=jax.ShapeDtypeStruct((padded, 1), jnp.float32),
        grid=grid,
        in_specs=[
            act_spec(1),                       # state tile
            act_spec(embed_dim),               # env_emb tile
            const_spec((input_dim, hidden)),   # w1  (f32, VPU layer)
            const_spec((1, hidden)),           # b1
            const_spec((hidden, hidden)),      # w2  (bf16)
            const_spec((1, hidden)),           # b2
            const_spec((hidden, hidden)),      # w3  (bf16)
            const_spec((1, hidden)),           # b3
            const_spec((1, hidden)),           # wo row (f32)
            const_spec((1, 1)),                # bo
        ],
        out_specs=pl.BlockSpec((tb, 1), lambda i: (i, 0)),
        compiler_params=pltpu.CompilerParams(
            dimension_semantics=("parallel",)),
        cost_estimate=pl.CostEstimate(
            flops=flops, transcendentals=0, bytes_accessed=bytes_accessed),
    )(state, env_emb, w1, b1, w2_bf, b2, w3_bf, b3, wo_row, bo_s)

    return out[:batch]


def init_actor_params(key, state_dim=1, embed_dim=3, hidden_dim=256):
    """Deterministic init matching nn.Linear's default U(-1/sqrt(fan_in), ...).

    Weights are stored pre-transposed as (in, out) so y = x @ W + b."""
    input_dim = state_dim + embed_dim

    def linear(key, fan_in, fan_out):
        kw, kb = jax.random.split(key)
        bound = 1.0 / jnp.sqrt(jnp.float32(fan_in))
        w = jax.random.uniform(kw, (fan_in, fan_out), jnp.float32, -bound, bound)
        b = jax.random.uniform(kb, (1, fan_out), jnp.float32, -bound, bound)
        return w, b

    k1, k2, k3, k4 = jax.random.split(key, 4)
    w1, b1 = linear(k1, input_dim, hidden_dim)
    w2, b2 = linear(k2, hidden_dim, hidden_dim)
    w3, b3 = linear(k3, hidden_dim, hidden_dim)
    wo, bo = linear(k4, hidden_dim, 1)
    return (w1, b1, w2, b2, w3, b3, wo, bo)


def actor_forward_f32_ref(state, env_emb, params):
    """Pure f32 reference (matches the PyTorch module's numerics)."""
    w1, b1, w2, b2, w3, b3, wo, bo = params
    x = jnp.concatenate([state, env_emb], axis=-1)
    h = jnp.maximum(x @ w1 + b1, 0.0)
    h = jnp.maximum(h @ w2 + b2, 0.0)
    h = jnp.maximum(h @ w3 + b3, 0.0)
    return h @ wo + bo


def actor_forward_mixed_ref(state, env_emb, params):
    """Reference mimicking the kernel's bf16-MXU / f32-accumulate numerics."""
    w1, b1, w2, b2, w3, b3, wo, bo = params
    x = jnp.concatenate([state, env_emb], axis=-1)
    h = jnp.maximum(x @ w1 + b1, 0.0)
    h = jnp.dot(h.astype(jnp.bfloat16), w2.astype(jnp.bfloat16),
                preferred_element_type=jnp.float32)
    h = jnp.maximum(h + b2, 0.0)
    h = jnp.dot(h.astype(jnp.bfloat16), w3.astype(jnp.bfloat16),
                preferred_element_type=jnp.float32)
    h = jnp.maximum(h + b3, 0.0)
    return jnp.sum(h * wo.reshape(1, -1), axis=-1, keepdims=True) + bo.reshape(1, 1)


if __name__ == "__main__":
    key = jax.random.PRNGKey(0)
    kp, kdata = jax.random.split(key)

    state_dim, embed_dim, hidden_dim = 1, 3, 256
    params = init_actor_params(kp, state_dim, embed_dim, hidden_dim)

    # Small single-tile batch, plus a larger non-multiple batch to exercise
    # the batch grid, resident weights and padding path.
    for batch in (8, 1000):
        ks, ke = jax.random.split(jax.random.fold_in(kdata, batch))
        state = jax.random.normal(ks, (batch, state_dim), jnp.float32)
        env_emb = jax.random.normal(ke, (batch, embed_dim), jnp.float32)

        out = actor_forward(state, env_emb, params)
        jax.block_until_ready(out)
        assert out.shape == (batch, 1), out.shape

        ref_mixed = actor_forward_mixed_ref(state, env_emb, params)
        ref_f32 = actor_forward_f32_ref(state, env_emb, params)

        err_mixed = float(jnp.max(jnp.abs(out - ref_mixed)))
        err_f32 = float(jnp.max(jnp.abs(out - ref_f32)))
        assert jnp.allclose(out, ref_mixed, atol=2e-2, rtol=2e-2), \
            f"batch={batch}: max abs err vs mixed ref = {err_mixed}"
        assert jnp.allclose(out, ref_f32, atol=6e-2, rtol=6e-2), \
            f"batch={batch}: max abs err vs f32 ref = {err_f32}"

    print("KERNEL_OK")
</pallas_src>

<mosaic_0001>
module attributes {stable_mosaic.version = 11 : i64} {
  func.func @_actor_kernel(%arg0: i32, %arg1: memref<8x1xf32, #tpu.memory_space<vmem>>, %arg2: memref<8x3xf32, #tpu.memory_space<vmem>>, %arg3: memref<4x256xf32, #tpu.memory_space<vmem>>, %arg4: memref<1x256xf32, #tpu.memory_space<vmem>>, %arg5: memref<256x256xbf16, #tpu.memory_space<vmem>>, %arg6: memref<1x256xf32, #tpu.memory_space<vmem>>, %arg7: memref<256x256xbf16, #tpu.memory_space<vmem>>, %arg8: memref<1x256xf32, #tpu.memory_space<vmem>>, %arg9: memref<1x256xf32, #tpu.memory_space<vmem>>, %arg10: memref<1x1xf32, #tpu.memory_space<vmem>>, %arg11: memref<8x1xf32, #tpu.memory_space<vmem>>) attributes {dimension_semantics = [#tpu.dimension_semantics<parallel>], iteration_bounds = array<i64: 1>, scalar_prefetch = 0 : i64, scratch_operands = 0 : i64, tpu.core_type = #tpu.core_type<tc>, window_params = [{transform_indices = @transform_0, window_bounds = array<i64: 8, 1>}, {transform_indices = @transform_1, window_bounds = array<i64: 8, 3>}, {pipeline_mode = #tpu.pipeline_mode<synchronous>, transform_indices = @transform_2, window_bounds = array<i64: 4, 256>}, {pipeline_mode = #tpu.pipeline_mode<synchronous>, transform_indices = @transform_3, window_bounds = array<i64: 1, 256>}, {pipeline_mode = #tpu.pipeline_mode<synchronous>, transform_indices = @transform_4, window_bounds = array<i64: 256, 256>}, {pipeline_mode = #tpu.pipeline_mode<synchronous>, transform_indices = @transform_5, window_bounds = array<i64: 1, 256>}, {pipeline_mode = #tpu.pipeline_mode<synchronous>, transform_indices = @transform_6, window_bounds = array<i64: 256, 256>}, {pipeline_mode = #tpu.pipeline_mode<synchronous>, transform_indices = @transform_7, window_bounds = array<i64: 1, 256>}, {pipeline_mode = #tpu.pipeline_mode<synchronous>, transform_indices = @transform_8, window_bounds = array<i64: 1, 256>}, {pipeline_mode = #tpu.pipeline_mode<synchronous>, transform_indices = @transform_9, window_bounds = array<i64: 1, 1>}, {transform_indices = @transform_10, window_bounds = array<i64: 8, 1>}]} {
    %c0 = arith.constant 0 : index
    %c0_0 = arith.constant 0 : index
    %0 = vector.load %arg1[%c0, %c0_0] : memref<8x1xf32, #tpu.memory_space<vmem>>, vector<8x1xf32>
    %c0_1 = arith.constant 0 : index
    %c0_2 = arith.constant 0 : index
    %1 = vector.load %arg2[%c0_1, %c0_2] : memref<8x3xf32, #tpu.memory_space<vmem>>, vector<8x3xf32>
    %c0_3 = arith.constant 0 : index
    %c0_4 = arith.constant 0 : index
    %2 = vector.load %arg3[%c0_3, %c0_4] : memref<4x256xf32, #tpu.memory_space<vmem>>, vector<4x256xf32>
    %c0_5 = arith.constant 0 : index
    %c0_6 = arith.constant 0 : index
    %3 = vector.load %arg4[%c0_5, %c0_6] : memref<1x256xf32, #tpu.memory_space<vmem>>, vector<1x256xf32>
    %4 = vector.extract_strided_slice %2 {offsets = [0, 0], sizes = [1, 256], strides = [1, 1]} : vector<4x256xf32> to vector<1x256xf32>
    %5 = vector.broadcast %0 : vector<8x1xf32> to vector<8x256xf32>
    %6 = vector.broadcast %4 : vector<1x256xf32> to vector<8x256xf32>
    %7 = arith.mulf %5, %6 : vector<8x256xf32>
    %8 = vector.broadcast %3 : vector<1x256xf32> to vector<8x256xf32>
    %9 = arith.addf %8, %7 : vector<8x256xf32>
    %10 = vector.extract_strided_slice %1 {offsets = [0, 0], sizes = [8, 1], strides = [1, 1]} : vector<8x3xf32> to vector<8x1xf32>
    %11 = vector.extract_strided_slice %2 {offsets = [1, 0], sizes = [1, 256], strides = [1, 1]} : vector<4x256xf32> to vector<1x256xf32>
    %12 = vector.broadcast %10 : vector<8x1xf32> to vector<8x256xf32>
    %13 = vector.broadcast %11 : vector<1x256xf32> to vector<8x256xf32>
    %14 = arith.mulf %12, %13 : vector<8x256xf32>
    %15 = arith.addf %9, %14 : vector<8x256xf32>
    %16 = vector.extract_strided_slice %1 {offsets = [0, 1], sizes = [8, 1], strides = [1, 1]} : vector<8x3xf32> to vector<8x1xf32>
    %17 = vector.extract_strided_slice %2 {offsets = [2, 0], sizes = [1, 256], strides = [1, 1]} : vector<4x256xf32> to vector<1x256xf32>
    %18 = vector.broadcast %16 : vector<8x1xf32> to vector<8x256xf32>
    %19 = vector.broadcast %17 : vector<1x256xf32> to vector<8x256xf32>
    %20 = arith.mulf %18, %19 : vector<8x256xf32>
    %21 = arith.addf %15, %20 : vector<8x256xf32>
    %22 = vector.extract_strided_slice %1 {offsets = [0, 2], sizes = [8, 1], strides = [1, 1]} : vector<8x3xf32> to vector<8x1xf32>
    %23 = vector.extract_strided_slice %2 {offsets = [3, 0], sizes = [1, 256], strides = [1, 1]} : vector<4x256xf32> to vector<1x256xf32>
    %24 = vector.broadcast %22 : vector<8x1xf32> to vector<8x256xf32>
    %25 = vector.broadcast %23 : vector<1x256xf32> to vector<8x256xf32>
    %26 = arith.mulf %24, %25 : vector<8x256xf32>
    %27 = arith.addf %21, %26 : vector<8x256xf32>
    %cst = arith.constant 0.000000e+00 : f32
    %28 = vector.broadcast %cst : f32 to vector<8x256xf32>
    %29 = arith.maximumf %27, %28 : vector<8x256xf32>
    %30 = arith.truncf %29 : vector<8x256xf32> to vector<8x256xbf16>
    %c0_7 = arith.constant 0 : index
    %c0_8 = arith.constant 0 : index
    %31 = vector.load %arg5[%c0_7, %c0_8] : memref<256x256xbf16, #tpu.memory_space<vmem>>, vector<256x256xbf16>
    %cst_9 = arith.constant dense<0.000000e+00> : vector<8x256xf32>
    %32 = tpu.matmul %30, %31, %cst_9 {dimension_numbers = #tpu.dot_dimension_numbers<[1], [0], [0], [1], [0, 0, 1, 1], [], []>} : vector<8x256xbf16>, vector<256x256xbf16>, vector<8x256xf32> -> vector<8x256xf32>
    %c0_10 = arith.constant 0 : index
    %c0_11 = arith.constant 0 : index
    %33 = vector.load %arg6[%c0_10, %c0_11] : memref<1x256xf32, #tpu.memory_space<vmem>>, vector<1x256xf32>
    %34 = vector.broadcast %33 : vector<1x256xf32> to vector<8x256xf32>
    %35 = arith.addf %32, %34 : vector<8x256xf32>
    %cst_12 = arith.constant 0.000000e+00 : f32
    %36 = vector.broadcast %cst_12 : f32 to vector<8x256xf32>
    %37 = arith.maximumf %35, %36 : vector<8x256xf32>
    %38 = arith.truncf %37 : vector<8x256xf32> to vector<8x256xbf16>
    %c0_13 = arith.constant 0 : index
    %c0_14 = arith.constant 0 : index
    %39 = vector.load %arg7[%c0_13, %c0_14] : memref<256x256xbf16, #tpu.memory_space<vmem>>, vector<256x256xbf16>
    %cst_15 = arith.constant dense<0.000000e+00> : vector<8x256xf32>
    %40 = tpu.matmul %38, %39, %cst_15 {dimension_numbers = #tpu.dot_dimension_numbers<[1], [0], [0], [1], [0, 0, 1, 1], [], []>} : vector<8x256xbf16>, vector<256x256xbf16>, vector<8x256xf32> -> vector<8x256xf32>
    %c0_16 = arith.constant 0 : index
    %c0_17 = arith.constant 0 : index
    %41 = vector.load %arg8[%c0_16, %c0_17] : memref<1x256xf32, #tpu.memory_space<vmem>>, vector<1x256xf32>
    %42 = vector.broadcast %41 : vector<1x256xf32> to vector<8x256xf32>
    %43 = arith.addf %40, %42 : vector<8x256xf32>
    %cst_18 = arith.constant 0.000000e+00 : f32
    %44 = vector.broadcast %cst_18 : f32 to vector<8x256xf32>
    %45 = arith.maximumf %43, %44 : vector<8x256xf32>
    %c0_19 = arith.constant 0 : index
    %c0_20 = arith.constant 0 : index
    %46 = vector.load %arg9[%c0_19, %c0_20] : memref<1x256xf32, #tpu.memory_space<vmem>>, vector<1x256xf32>
    %47 = vector.broadcast %46 : vector<1x256xf32> to vector<8x256xf32>
    %48 = arith.mulf %45, %47 : vector<8x256xf32>
    %cst_21 = arith.constant dense<0.000000e+00> : vector<8xf32>
    %49 = vector.multi_reduction <add>, %48, %cst_21 [1] : vector<8x256xf32> to vector<8xf32>
    %50 = vector.shape_cast %49 : vector<8xf32> to vector<8x1xf32>
    %c0_22 = arith.constant 0 : index
    %c0_23 = arith.constant 0 : index
    %51 = vector.load %arg10[%c0_22, %c0_23] : memref<1x1xf32, #tpu.memory_space<vmem>>, vector<1x1xf32>
    %52 = vector.broadcast %51 : vector<1x1xf32> to vector<8x1xf32>
    %53 = arith.addf %50, %52 : vector<8x1xf32>
    %c0_24 = arith.constant 0 : index
    %c0_25 = arith.constant 0 : index
    %54 = vector.load %arg11[%c0_24, %c0_25] : memref<8x1xf32, #tpu.memory_space<vmem>>, vector<8x1xf32>
    tpu.vector_store %arg11[%c0_24, %c0_25], %53 {strides = array<i32>} : memref<8x1xf32, #tpu.memory_space<vmem>>, vector<8x1xf32>,
    return
  }
  func.func @transform_0(%arg0: i32) -> (i32, i32) {
    %c0_i32 = arith.constant 0 : i32
    %c0_i32_0 = arith.constant 0 : i32
    return %arg0, %c0_i32 : i32, i32
  }
  func.func @transform_1(%arg0: i32) -> (i32, i32) {
    %c0_i32 = arith.constant 0 : i32
    %c0_i32_0 = arith.constant 0 : i32
    return %arg0, %c0_i32 : i32, i32
  }
  func.func @transform_2(%arg0: i32) -> (i32, i32) {
    %c0_i32 = arith.constant 0 : i32
    %c0_i32_0 = arith.constant 0 : i32
    %c0_i32_1 = arith.constant 0 : i32
    return %c0_i32, %c0_i32_0 : i32, i32
  }
  func.func @transform_3(%arg0: i32) -> (i32, i32) {
    %c0_i32 = arith.constant 0 : i32
    %c0_i32_0 = arith.constant 0 : i32
    %c0_i32_1 = arith.constant 0 : i32
    return %c0_i32, %c0_i32_0 : i32, i32
  }
  func.func @transform_4(%arg0: i32) -> (i32, i32) {
    %c0_i32 = arith.constant 0 : i32
    %c0_i32_0 = arith.constant 0 : i32
    %c0_i32_1 = arith.constant 0 : i32
    return %c0_i32, %c0_i32_0 : i32, i32
  }
  func.func @transform_5(%arg0: i32) -> (i32, i32) {
    %c0_i32 = arith.constant 0 : i32
    %c0_i32_0 = arith.constant 0 : i32
    %c0_i32_1 = arith.constant 0 : i32
    return %c0_i32, %c0_i32_0 : i32, i32
  }
  func.func @transform_6(%arg0: i32) -> (i32, i32) {
    %c0_i32 = arith.constant 0 : i32
    %c0_i32_0 = arith.constant 0 : i32
    %c0_i32_1 = arith.constant 0 : i32
    return %c0_i32, %c0_i32_0 : i32, i32
  }
  func.func @transform_7(%arg0: i32) -> (i32, i32) {
    %c0_i32 = arith.constant 0 : i32
    %c0_i32_0 = arith.constant 0 : i32
    %c0_i32_1 = arith.constant 0 : i32
    return %c0_i32, %c0_i32_0 : i32, i32
  }
  func.func @transform_8(%arg0: i32) -> (i32, i32) {
    %c0_i32 = arith.constant 0 : i32
    %c0_i32_0 = arith.constant 0 : i32
    %c0_i32_1 = arith.constant 0 : i32
    return %c0_i32, %c0_i32_0 : i32, i32
  }
  func.func @transform_9(%arg0: i32) -> (i32, i32) {
    %c0_i32 = arith.constant 0 : i32
    %c0_i32_0 = arith.constant 0 : i32
    %c0_i32_1 = arith.constant 0 : i32
    return %c0_i32, %c0_i32_0 : i32, i32
  }
  func.func @transform_10(%arg0: i32) -> (i32, i32) {
    %c0_i32 = arith.constant 0 : i32
    %c0_i32_0 = arith.constant 0 : i32
    return %arg0, %c0_i32 : i32, i32
  }
}

</mosaic_0001>

<bundles_post_ra>
// kernel: actor_forward.1
= control target key start
LH: loop header
LB: loop body
LE: loop exit
PB: predicated region body
PF: predicated region fallthrough
CT: control target
= control target key end

     0   :  { %v858_v0 = vmov 0   ;;  %v859_v2 = vmov 1   ;;  %v860_v8 = vmov 2   ;;  %vm684_vm0 = vcmask 7168   ;;  %s1153_s0 = inlined_call_operand.vmem [shape: f32[8,1], index: 0, kind: input, shape index: {}]   ;;  %s1154_s1 = inlined_call_operand.vmem [shape: f32[8,3], index: 1, kind: input, shape index: {}]   ;;  %s1155_s4 = inlined_call_operand.vmem [shape: bf16[256,256], index: 4, kind: input, shape index: {}]   ;;  %s1156_s6 = inlined_call_operand.vmem [shape: bf16[256,256], index: 6, kind: input, shape index: {}]   ;;  %s1157_s2 = inlined_call_operand.vmem [shape: f32[4,256], index: 2, kind: input, shape index: {}]   ;;  %s1158_s3 = inlined_call_operand.vmem [shape: f32[1,256], index: 3, kind: input, shape index: {}]   ;;  %s1159_s5 = inlined_call_operand.vmem [shape: f32[1,256], index: 5, kind: input, shape index: {}]   ;;  %s1160_s9 = inlined_call_operand.<no memory space> [shape: f32[1,1], index: 9, kind: input, shape index: {}]   ;;  %s1161_s7 = inlined_call_operand.vmem [shape: f32[1,256], index: 7, kind: input, shape index: {}]   ;;  %s1162_s8 = inlined_call_operand.vmem [shape: f32[1,256], index: 8, kind: input, shape index: {}]   ;;  %s1163_s10 = inlined_call_operand.vmem [shape: f32[8,1], index: 10, kind: output, shape index: {}]  }
   0x1   :  { %758 = vset.pattern.permute.xlu0 %v858_v0  ;;  %v37_v1 = vld [vmem:[%s1153_s0] sm:$0xff]  ;;  %759 = vset.pattern.permute.xlu1 %v859_v2  ;;  %v765_v6 = vld [vmem:[%s1155_s4 + $0x14] ss:$8 sps:$4 sm:$0xff]   ;;  %v767_v7 = vld [vmem:[%s1155_s4 + $0x10] ss:$8 sps:$4 sm:$0xff]  }
   0x2   :  { %v38_v3 = vld [vmem:[%s1154_s1] sm:$0xff]  ;;  %43 = vperm.xlu0 %758, %v37_v1   ;;  %v771_v11 = vld [vmem:[%s1155_s4 + $0x34] ss:$8 sps:$4 sm:$0xff]   ;;  %v773_v12 = vld [vmem:[%s1155_s4 + $0x30] ss:$8 sps:$4 sm:$0xff]   ;;  %v47_v1 = vlaneseq }
   0x3   :  { %108 = vperm.xlu1 %759, %v38_v3   ;;  %v762_v4 = vld [vmem:[%s1155_s4 + $0x4] ss:$8 sps:$4 sm:$0xff]   ;;  %v764_v5 = vld [vmem:[%s1155_s4] ss:$8 sps:$4 sm:$0xff]   ;;  %v777_v15 = vld [vmem:[%s1155_s4 + $0x54] ss:$8 sps:$4 sm:$0xff]  }
   0x4   :  { %367 = vmatprep.subr.bf16.mxu0 %v762_v4  ;;  %v768_v9 = vld [vmem:[%s1155_s4 + $0x24] ss:$8 sps:$4 sm:$0xff]   ;;  %v770_v10 = vld [vmem:[%s1155_s4 + $0x20] ss:$8 sps:$4 sm:$0xff]   ;;  %v779_v16 = vld [vmem:[%s1155_s4 + $0x50] ss:$8 sps:$4 sm:$0xff]  }
   0x5   :  { %368 = vmatpush1.bf16.msra.mxu0 %v764_v5  ;;  %v774_v13 = vld [vmem:[%s1155_s4 + $0x44] ss:$8 sps:$4 sm:$0xff]   ;;  %v776_v14 = vld [vmem:[%s1155_s4 + $0x40] ss:$8 sps:$4 sm:$0xff]   ;;  %v813_v21 = vld [vmem:[%s1156_s6 + $0x14] ss:$8 sps:$4 sm:$0xff]  }
   0x6   :  { %82 = vperm.xlu0 %758, %v38_v3   ;;  %369 = vmatprep.subr.bf16.mxu0 %v765_v6  ;;  %v780_v17 = vld [vmem:[%s1155_s4 + $0x64] ss:$8 sps:$4 sm:$0xff]   ;;  %v782_v18 = vld [vmem:[%s1155_s4 + $0x60] ss:$8 sps:$4 sm:$0xff]   ;;  %v783_v22 = vld [vmem:[%s1155_s4 + $0x74] ss:$8 sps:$4 sm:$0xff]  }
   0x7   :  { %760 = vset.pattern.permute.xlu1 %v860_v8  ;;  %v810_v19 = vld [vmem:[%s1156_s6 + $0x4] ss:$8 sps:$4 sm:$0xff]   ;;  %v812_v20 = vld [vmem:[%s1156_s6] ss:$8 sps:$4 sm:$0xff]   ;;  %v815_v23 = vld [vmem:[%s1156_s6 + $0x10] ss:$8 sps:$4 sm:$0xff]  }
   0x8   :  { %134 = vperm.xlu1 %760, %v38_v3   ;;  %616 = vmatprep.subr.bf16.mxu1 %v810_v19  ;;  %v816_v24 = vld [vmem:[%s1156_s6 + $0x24] ss:$8 sps:$4 sm:$0xff]   ;;  %v785_v25 = vld [vmem:[%s1155_s4 + $0x70] ss:$8 sps:$4 sm:$0xff]   ;;  %v818_v27 = vld [vmem:[%s1156_s6 + $0x20] ss:$8 sps:$4 sm:$0xff]  }
   0x9   :  { %370 = vmatpush1.bf16.msra.mxu0 %v767_v7  ;;  %617 = vmatpush1.bf16.msra.mxu1 %v812_v20  ;;  %v786_v26 = vld [vmem:[%s1155_s4 + $0x84] ss:$8 sps:$4 sm:$0xff]   ;;  %v819_v28 = vld [vmem:[%s1156_s6 + $0x34] ss:$8 sps:$4 sm:$0xff]   ;;  %v788_v29 = vld [vmem:[%s1155_s4 + $0x80] ss:$8 sps:$4 sm:$0xff]  }
   0xa   :  { %371 = vmatprep.subr.bf16.mxu0 %v768_v9  ;;  %761 = vset.pattern.permute.xlu0 %v860_v8  ;;  %v789_v30 = vld [vmem:[%s1155_s4 + $0x94] ss:$8 sps:$4 sm:$0xff]   ;;  %v821_v31 = vld [vmem:[%s1156_s6 + $0x30] ss:$8 sps:$4 sm:$0xff]   ;;  %v822_v32 = vld [vmem:[%s1156_s6 + $0x44] ss:$8 sps:$4 sm:$0xff]  }
   0xb   :  { %618 = vmatprep.subr.bf16.mxu1 %v813_v21  ;;  %v791_v33 = vld [vmem:[%s1155_s4 + $0x90] ss:$8 sps:$4 sm:$0xff]   ;;  %v792_v34 = vld [vmem:[%s1155_s4 + $0xa4] ss:$8 sps:$4 sm:$0xff]   ;;  %v824_v35 = vld [vmem:[%s1156_s6 + $0x40] ss:$8 sps:$4 sm:$0xff]  }
   0xc   :  { %v825_v36 = vld [vmem:[%s1156_s6 + $0x54] ss:$8 sps:$4 sm:$0xff]   ;;  %v794_v37 = vld [vmem:[%s1155_s4 + $0xa0] ss:$8 sps:$4 sm:$0xff]   ;;  %v827_v39 = vld [vmem:[%s1156_s6 + $0x50] ss:$8 sps:$4 sm:$0xff]  }
   0xd   :  { %372 = vmatpush1.bf16.msra.mxu0 %v770_v10  ;;  %619 = vmatpush1.bf16.msra.mxu1 %v815_v23  ;;  %v795_v38 = vld [vmem:[%s1155_s4 + $0xb4] ss:$8 sps:$4 sm:$0xff]   ;;  %v828_v40 = vld [vmem:[%s1156_s6 + $0x64] ss:$8 sps:$4 sm:$0xff]   ;;  %v797_v41 = vld [vmem:[%s1155_s4 + $0xb0] ss:$8 sps:$4 sm:$0xff]  }
   0xe   :  { %373 = vmatprep.subr.bf16.mxu0 %v771_v11  ;;  %620 = vmatprep.subr.bf16.mxu1 %v816_v24  ;;  %v798_v42 = vld [vmem:[%s1155_s4 + $0xc4] ss:$8 sps:$4 sm:$0xff]   ;;  %v830_v43 = vld [vmem:[%s1156_s6 + $0x60] ss:$8 sps:$4 sm:$0xff]   ;;  %v831_v44 = vld [vmem:[%s1156_s6 + $0x74] ss:$8 sps:$4 sm:$0xff]  }
   0xf   :  { %v800_v45 = vld [vmem:[%s1155_s4 + $0xc0] ss:$8 sps:$4 sm:$0xff]   ;;  %v801_v46 = vld [vmem:[%s1155_s4 + $0xd4] ss:$8 sps:$4 sm:$0xff]   ;;  %v833_v47 = vld [vmem:[%s1156_s6 + $0x70] ss:$8 sps:$4 sm:$0xff]  }
  0x10   :  { %v834_v48 = vld [vmem:[%s1156_s6 + $0x84] ss:$8 sps:$4 sm:$0xff]   ;;  %v803_v49 = vld [vmem:[%s1155_s4 + $0xd0] ss:$8 sps:$4 sm:$0xff]   ;;  %v836_v51 = vld [vmem:[%s1156_s6 + $0x80] ss:$8 sps:$4 sm:$0xff]  }
  0x11   :  { %374 = vmatpush1.bf16.msra.mxu0 %v773_v12  ;;  %621 = vmatpush1.bf16.msra.mxu1 %v818_v27  ;;  %v804_v50 = vld [vmem:[%s1155_s4 + $0xe4] ss:$8 sps:$4 sm:$0xff]   ;;  %v837_v52 = vld [vmem:[%s1156_s6 + $0x94] ss:$8 sps:$4 sm:$0xff]   ;;  %v806_v53 = vld [vmem:[%s1155_s4 + $0xe0] ss:$8 sps:$4 sm:$0xff]  }
  0x12   :  { %375 = vmatprep.subr.bf16.mxu0 %v774_v13  ;;  %622 = vmatprep.subr.bf16.mxu1 %v819_v28  ;;  %v807_v54 = vld [vmem:[%s1155_s4 + $0xf4] ss:$8 sps:$4 sm:$0xff]   ;;  %v839_v55 = vld [vmem:[%s1156_s6 + $0x90] ss:$8 sps:$4 sm:$0xff]   ;;  %v840_v56 = vld [vmem:[%s1156_s6 + $0xa4] ss:$8 sps:$4 sm:$0xff]  }
  0x13   :  { %v809_v57 = vld [vmem:[%s1155_s4 + $0xf0] ss:$8 sps:$4 sm:$0xff]   ;;  %v842_v58 = vld [vmem:[%s1156_s6 + $0xa0] ss:$8 sps:$4 sm:$0xff]   ;;  %v843_v59 = vld [vmem:[%s1156_s6 + $0xb4] ss:$8 sps:$4 sm:$0xff]  }
  0x14   :  { %v845_v60 = vld [vmem:[%s1156_s6 + $0xb0] ss:$8 sps:$4 sm:$0xff]   ;;  %v846_v61 = vld [vmem:[%s1156_s6 + $0xc4] ss:$8 sps:$4 sm:$0xff]   ;;  %v848_v62 = vld [vmem:[%s1156_s6 + $0xc0] ss:$8 sps:$4 sm:$0xff]  }
  0x15   :  { %376 = vmatpush1.bf16.msra.mxu0 %v776_v14  ;;  %623 = vmatpush1.bf16.msra.mxu1 %v821_v31  ;;  %v849_v63 = vld [vmem:[%s1156_s6 + $0xd4] ss:$8 sps:$4 sm:$0xff]   ;;  %v851_v0 = vld [vmem:[%s1156_s6 + $0xd0] ss:$8 sps:$4 sm:$0xff]   ;;  %v48_v2 = vshrl.u32 %v47_v1, 7  ;;  %v39_v5 = vld [vmem:[%s1157_s2] sm:$0xff] }
  0x16   :  { %377 = vmatprep.subr.bf16.mxu0 %v777_v15  ;;  %624 = vmatprep.subr.bf16.mxu1 %v822_v32  ;;  %v40_v14 = vld [vmem:[%s1158_s3] sm:$0x3] }
  0x17   :  { %v1102_v3 = vsub.s32 0, %v48_v2  ;;  %v53_v4 = vsub.s32 4, %v48_v2  ;;  %v1108_v8 = vsub.s32 1, %v48_v2  ;;  %v91_v9 = vsub.s32 5, %v48_v2 }
  0x18   :  { %v113_v10 = vsub.s32 2, %v48_v2  ;;  %v117_v11 = vsub.s32 6, %v48_v2  ;;  %v139_v12 = vsub.s32 3, %v48_v2  ;;  %v143_v13 = vsub.s32 7, %v48_v2 }
  0x19   :  { %378 = vmatpush1.bf16.msra.mxu0 %v779_v16  ;;  %625 = vmatpush1.bf16.msra.mxu1 %v824_v35  ;;  %v50_v6 = vrot.slane %v39_v5, %v1102_v3  ;;  %v54_v7 = vrot.slane %v39_v5, %v53_v4  ;;  %v71_v23 = vrot.slane %v40_v14, %v1102_v3 }
  0x1a   :  { %379 = vmatprep.subr.bf16.mxu0 %v780_v17  ;;  %626 = vmatprep.subr.bf16.mxu1 %v825_v36  ;;  %v88_v17 = vrot.slane %v39_v5, %v1108_v8  ;;  %v114_v19 = vrot.slane %v39_v5, %v113_v10  ;;  %v118_v20 = vrot.slane %v39_v5, %v117_v11  ;;  %v444_v11 = vld [vmem:[%s1161_s7] sm:$0x3] }
  0x1b   :  { %v60_v15 = vrot.slane %v50_v6, %v1102_v3  ;;  %v64_v16 = vrot.slane %v54_v7, %v1102_v3  ;;  %v140_v21 = vrot.slane %v39_v5, %v139_v12  ;;  %v75_v24 = vrot.slane %v40_v14, %v1108_v8 }
  0x1c   :  { %v124_v31 = vrot.slane %v114_v19, %v113_v10  ;;  %v128_v32 = vrot.slane %v118_v20, %v113_v10  ;;  %v15_v10 = vstv %s1160_s9  ;;  %v453_v14 = vrot.slane %v444_v11, %v1108_v8 }
  0x1d   :  { %380 = vmatpush1.bf16.msra.mxu0 %v782_v18  ;;  %627 = vmatpush1.bf16.msra.mxu1 %v827_v39  ;;  %v92_v18 = vrot.slane %v39_v5, %v91_v9  ;;  %16 = vst [vmem:[#allocation2] sm:$0x1] %v15_v10 }
  0x1e   :  { %381 = vmatprep.subr.bf16.mxu0 %v783_v22  ;;  %628 = vmatprep.subr.bf16.mxu1 %v828_v40  ;;  %v144_v22 = vrot.slane %v39_v5, %v143_v13  ;;  %v659_v13 = vld [vmem:[%s1162_s8] sm:$0x3] }
  0x1f   :  { %v668_v20 = vrot.slane %v659_v13, %v1108_v8 }
  0x21   :  { %382 = vmatpush1.bf16.msra.mxu0 %v785_v25  ;;  %629 = vmatpush1.bf16.msra.mxu1 %v830_v43 }
  0x22   :  { %383 = vmatprep.subr.bf16.mxu0 %v786_v26  ;;  %630 = vmatprep.subr.bf16.mxu1 %v831_v44 }
  0x25   :  { %384 = vmatpush1.bf16.msra.mxu0 %v788_v29  ;;  %631 = vmatpush1.bf16.msra.mxu1 %v833_v47  ;;  %v98_v29 = vrot.slane %v88_v17, %v1108_v8  ;;  %v664_v17 = vrot.slane %v659_v13, %v1102_v3 }
  0x26   :  { %385 = vmatprep.subr.bf16.mxu0 %v789_v30  ;;  %632 = vmatprep.subr.bf16.mxu1 %v834_v48  ;;  %v102_v30 = vrot.slane %v92_v18, %v1108_v8 }
  0x29   :  { %386 = vmatpush1.bf16.msra.mxu0 %v791_v33  ;;  %633 = vmatpush1.bf16.msra.mxu1 %v836_v51  ;;  %v150_v33 = vrot.slane %v140_v21, %v139_v12 }
  0x2a   :  { %387 = vmatprep.subr.bf16.mxu0 %v792_v34  ;;  %634 = vmatprep.subr.bf16.mxu1 %v837_v52  ;;  %v154_v34 = vrot.slane %v144_v22, %v139_v12  ;;  %v449_v12 = vrot.slane %v444_v11, %v1102_v3 }
  0x2d   :  { %388 = vmatpush1.bf16.msra.mxu0 %v794_v37  ;;  %635 = vmatpush1.bf16.msra.mxu1 %v839_v55  ;;  %v852_v55 = vld [vmem:[%s1156_s6 + $0xe4] ss:$8 sps:$4 sm:$0xff]  }
  0x2e   :  { %389 = vmatprep.subr.bf16.mxu0 %v795_v38  ;;  %636 = vmatprep.subr.bf16.mxu1 %v840_v56  ;;  %v854_v56 = vld [vmem:[%s1156_s6 + $0xe0] ss:$8 sps:$4 sm:$0xff]  }
  0x31   :  { %390 = vmatpush1.bf16.msra.mxu0 %v797_v41  ;;  %637 = vmatpush1.bf16.msra.mxu1 %v842_v58  ;;  %v857_v58 = vld [vmem:[%s1156_s6 + $0xf0] ss:$8 sps:$4 sm:$0xff]  }
  0x32   :  { %391 = vmatprep.subr.bf16.mxu0 %v798_v42  ;;  %638 = vmatprep.subr.bf16.mxu1 %v843_v59  ;;  %v195_v59 = vld [vmem:[%s1159_s5] sm:$0x3] }
  0x35   :  { %392 = vmatpush1.bf16.msra.mxu0 %v800_v45  ;;  %639 = vmatpush1.bf16.msra.mxu1 %v845_v60  ;;  %v200_v60 = vrot.slane %v195_v59, %v1102_v3 }
  0x36   :  { %393 = vmatprep.subr.bf16.mxu0 %v801_v46  ;;  %640 = vmatprep.subr.bf16.mxu1 %v846_v61  ;;  %v204_v61 = vrot.slane %v195_v59, %v1108_v8 }
  0x39   :  { %394 = vmatpush1.bf16.msra.mxu0 %v803_v49  ;;  %641 = vmatpush1.bf16.msra.mxu1 %v848_v62 }
  0x3a   :  { %395 = vmatprep.subr.bf16.mxu0 %v804_v50  ;;  %642 = vmatprep.subr.bf16.mxu1 %v849_v63 }
  0x3d   :  { %396 = vmatpush1.bf16.msra.mxu0 %v806_v53  ;;  %643 = vmatpush1.bf16.msra.mxu1 %v851_v0 }
  0x3e   :  { %397 = vmatprep.subr.bf16.mxu0 %v807_v54  ;;  %644 = vmatprep.subr.bf16.mxu1 %v852_v55 }
  0x41   :  { %398 = vmatpush1.bf16.msra.mxu0 %v809_v57  ;;  %645 = vmatpush1.bf16.msra.mxu1 %v854_v56  ;;  %v855_v57 = vld [vmem:[%s1156_s6 + $0xf4] ss:$8 sps:$4 sm:$0xff]  }
  0x42   :  { %646 = vmatprep.subr.bf16.mxu1 %v855_v57 }
  0x45   :  { %647 = vmatpush1.bf16.msra.mxu1 %v857_v58 }
  0x81   :  { %v44_v25 = vpop.permute.xlu0 %43 }
  0x82   :  { %v109_v26 = vpop.permute.xlu1 %108  ;;  %v65_v27 = vmul.f32 %v60_v15, %v44_v25  ;;  %v66_v28 = vmul.f32 %v64_v16, %v44_v25 }
  0x83   :  { %v129_v41 = vmul.f32 %v124_v31, %v109_v26  ;;  %v130_v42 = vmul.f32 %v128_v32, %v109_v26 }
  0x84   :  { %v78_v36 = vadd.f32 %v71_v23, %v65_v27  ;;  %v79_v37 = vadd.f32 %v75_v24, %v66_v28  ;;  %v754_v28 = vld [vmem:[#allocation2] ss:$0 sm:$0xff] }
  0x85   :  { %v83_v35 = vpop.permute.xlu0 %82 }
  0x86   :  { %v103_v38 = vmul.f32 %v98_v29, %v83_v35  ;;  %v104_v39 = vmul.f32 %v102_v30, %v83_v35 }
  0x87   :  { %v135_v40 = vpop.permute.xlu1 %134 }
  0x88   :  { %v105_v43 = vadd.f32 %v103_v38, %v78_v36  ;;  %v106_v44 = vadd.f32 %v104_v39, %v79_v37  ;;  %v155_v45 = vmul.f32 %v150_v33, %v135_v40  ;;  %v156_v46 = vmul.f32 %v154_v34, %v135_v40 }
  0x8a   :  { %v131_v47 = vadd.f32 %v129_v41, %v105_v43  ;;  %v132_v48 = vadd.f32 %v130_v42, %v106_v44 }
  0x8c   :  { %v157_v49 = vadd.f32 %v155_v45, %v131_v47  ;;  %v158_v50 = vadd.f32 %v156_v46, %v132_v48 }
  0x8e   :  { %v159_v51 = vmax.f32 %v157_v49, 0.0  ;;  %v160_v52 = vmax.f32 %v158_v50, 0.0 }
  0x90   :  { %v161_v53 = vpack.c.bf16 %v159_v51, %v159_v51  ;;  %v162_v54 = vpack.c.bf16 %v160_v52, %v160_v52 }
  0x92   :  { %399 = vmatprep.mubr.bf16.mxu0 %v162_v54 }
  0x93   :  { %400 = vmatmul.mubr.bf16.vlgmr.msra.gmra.mrb[0].mxu0 %v161_v53 }
 0x166   :  { %v401_v62 = vpop.f32.mrb[0].mxu0 }
 0x167   :  { %v402_v63 = vadd.f32 %v401_v62, %v200_v60  ;;  %v403_v0 = vpop.f32.mrb[1].mxu0 }
 0x168   :  { %v404_v1 = vadd.f32 %v403_v0, %v204_v61  ;;  %v405_v2 = vpop.f32.mrb[2].mxu0 }
 0x169   :  { %v408_v4 = vmax.f32 %v402_v63, 0.0  ;;  %v406_v5 = vpop.f32.mrb[3].mxu0 }
 0x16a   :  { %v409_v6 = vmax.f32 %v404_v1, 0.0 }
 0x16b   :  { %v410_v9 = vpack.c.bf16 %v408_v4, %v408_v4 }
 0x16c   :  { %v411_v7 = vpack.c.bf16 %v409_v6, %v409_v6 }
 0x16e   :  { %648 = vmatprep.mubr.bf16.mxu1 %v411_v7 }
 0x16f   :  { %649 = vmatmul.mubr.bf16.vlgmr.msra.gmra.mrb[0].mxu1 %v410_v9 }
 0x242   :  { %v650_v15 = vpop.f32.mrb[0].mxu1 }
 0x243   :  { %v651_v16 = vadd.f32 %v650_v15, %v449_v12  ;;  %v652_v18 = vpop.f32.mrb[1].mxu1 }
 0x244   :  { %v653_v19 = vadd.f32 %v652_v18, %v453_v14  ;;  %v654_v21 = vpop.f32.mrb[2].mxu1 }
 0x245   :  { %v657_v22 = vmax.f32 %v651_v16, 0.0  ;;  %v655_v23 = vpop.f32.mrb[3].mxu1 }
 0x246   :  { %v658_v24 = vmax.f32 %v653_v19, 0.0 }
 0x247   :  { %v671_v25 = vmul.f32 %v664_v17, %v657_v22 }
 0x248   :  { %v672_v26 = vmul.f32 %v668_v20, %v658_v24 }
 0x24a   :  { %v673_v27 = vadd.f32 %v672_v26, %v671_v25 }
 0x24c   :  { %674 = vadd.xlane.f32.xlu0 %v673_v27 }
 0x2d9   :  { %v675_v29 = vpop.xlane.xlu0 %674 }
 0x2da   :  { %v683_v30 = vadd.f32 %v754_v28, %v675_v29 }
 0x2dc   :  { %685 = vst.msk [vmem:[%s1163_s10] sm:$0xff] %vm684_vm0, %v683_v30 }

</bundles_post_ra>
